<compile_context>
chip_gen: v6e
topology: v6e:2x2x1
jax: 0.10.0
libtpu: 0.0.40
codegen_flags: <defaults>
</compile_context>

<pallas_src>
import functools

import jax
import jax.numpy as jnp
from jax.experimental import pallas as pl
from jax.experimental.pallas import tpu as pltpu

D_IN = 384   # input / reconstruction dim
D_H = 128    # hidden dim
D_Z = 32     # latent dim


def _ae_kernel(x_ref,
               w1_ref, b1_ref,
               w2_ref, b2_ref,
               w23_ref, b23_ref,
               w4_ref, b4_ref,
               xr_ref, z_ref, *, compute_dtype):
    x = x_ref[...]

    # encoder L1: Linear(384,128) + ReLU   (f32 accumulation on the MXU)
    h1 = jnp.dot(x, w1_ref[...], preferred_element_type=jnp.float32) + b1_ref[...]
    h1 = jnp.maximum(h1, 0.0).astype(compute_dtype)

    # encoder L2: Linear(128,32) -> latent z
    z = jnp.dot(h1, w2_ref[...], preferred_element_type=jnp.float32) + b2_ref[...]

    # folded encoder-L2 @ decoder-L1 (no nonlinearity in between):
    #   h2 = relu(h1 @ (w2 @ w3) + (b2 @ w3 + b3))
    h2 = jnp.dot(h1, w23_ref[...], preferred_element_type=jnp.float32) + b23_ref[...]
    h2 = jnp.maximum(h2, 0.0).astype(compute_dtype)

    # decoder L2: Linear(128,384) -> reconstruction
    xr = jnp.dot(h2, w4_ref[...], preferred_element_type=jnp.float32) + b4_ref[...]

    z_ref[...] = z.astype(z_ref.dtype)
    xr_ref[...] = xr.astype(xr_ref.dtype)


def _round_up(n, m):
    return (n + m - 1) // m * m


def _pick_batch_tile(b_padded):
    """Largest batch tile (<=512, multiple of 8) dividing b_padded while
    keeping >= 2 grid steps so both v7x TensorCores get work."""
    candidates = (512, 256, 128, 64, 32, 16, 8)
    for tb in candidates:
        if b_padded % tb == 0 and b_padded // tb >= 2:
            return tb
    for tb in candidates:
        if b_padded % tb == 0:
            return tb
    return 8


def dream_autoencoder(x, params, *, compute_dtype=jnp.bfloat16):
    """x: (B, 384). Returns (x_recon (B,384) f32, z (B,32) f32)."""
    B, d_in = x.shape
    assert d_in == D_IN
    (w1, b1, w2, b2, w3, b3, w4, b4) = params

    cd = jnp.dtype(compute_dtype)
    f32 = jnp.float32

    # Fold the two K/N=32 matmuls: no nonlinearity between encoder L2 and
    # decoder L1, so  z @ w3 + b3 == h1 @ (w2 @ w3) + (b2 @ w3 + b3).
    w23 = w2.astype(f32) @ w3.astype(f32)                    # (128, 128)
    b23 = b2.astype(f32) @ w3.astype(f32) + b3.astype(f32)   # (1, 128)

    # Weights/activations stream in compute_dtype (bf16 by default); biases
    # stay f32 and are added to the f32 MXU accumulators.
    w1c, w2c, w23c, w4c = (w.astype(cd) for w in (w1, w2, w23, w4))
    b1f, b2f, b23f, b4f = (b.astype(f32) for b in (b1, b2, b23, b4))

    # Pad the batch to a tile multiple and pick a large batch tile.
    b_pad = _round_up(max(B, 8), 8)
    tb = _pick_batch_tile(b_pad)
    b_pad = _round_up(b_pad, tb)
    xp = x.astype(cd)
    if b_pad != B:
        xp = jnp.pad(xp, ((0, b_pad - B), (0, 0)))

    grid = (b_pad // tb,)

    def full(shape):
        # whole-array block, resident across the (parallel) batch grid
        return pl.BlockSpec(shape, lambda i: (0,) * len(shape))

    # Explicit scoped-VMEM budget: double-buffered x / xr / z tiles plus the
    # (resident, possibly double-buffered) weights, with headroom.
    x_bytes = cd.itemsize
    tile_bytes = 2 * tb * (D_IN * x_bytes + D_IN * 4 + D_Z * 4)
    w_elems = D_IN * D_H + D_H * D_Z + D_H * D_H + D_H * D_IN
    b_elems = D_H + D_Z + D_H + D_IN
    weight_bytes = 2 * (w_elems * x_bytes + b_elems * 4)
    vmem_limit = max(int(tile_bytes + weight_bytes) + (4 << 20), 16 << 20)

    xr, z = pl.pallas_call(
        functools.partial(_ae_kernel, compute_dtype=cd),
        out_shape=(
            jax.ShapeDtypeStruct((b_pad, D_IN), jnp.float32),
            jax.ShapeDtypeStruct((b_pad, D_Z), jnp.float32),
        ),
        grid=grid,
        in_specs=[
            pl.BlockSpec((tb, D_IN), lambda i: (i, 0)),   # x tile
            full((D_IN, D_H)), full((1, D_H)),            # encoder L1
            full((D_H, D_Z)), full((1, D_Z)),             # encoder L2 (-> z)
            full((D_H, D_H)), full((1, D_H)),             # folded enc-L2 @ dec-L1
            full((D_H, D_IN)), full((1, D_IN)),           # decoder L2
        ],
        out_specs=(
            pl.BlockSpec((tb, D_IN), lambda i: (i, 0)),
            pl.BlockSpec((tb, D_Z), lambda i: (i, 0)),
        ),
        compiler_params=pltpu.CompilerParams(
            dimension_semantics=("parallel",),
            vmem_limit_bytes=vmem_limit,
        ),
    )(xp, w1c, b1f, w2c, b2f, w23c, b23f, w4c, b4f)

    if b_pad != B:
        xr = xr[:B]
        z = z[:B]
    return xr, z


def init_params(key):
    """PyTorch nn.Linear default init (U[-1/sqrt(fan_in), 1/sqrt(fan_in)]).
    Weights stored as (in_features, out_features)."""
    def linear(key, fan_in, fan_out):
        kw, kb = jax.random.split(key)
        bound = 1.0 / jnp.sqrt(fan_in)
        w = jax.random.uniform(kw, (fan_in, fan_out), jnp.float32, -bound, bound)
        b = jax.random.uniform(kb, (1, fan_out), jnp.float32, -bound, bound)
        return w, b

    k1, k2, k3, k4 = jax.random.split(key, 4)
    w1, b1 = linear(k1, D_IN, D_H)   # encoder.0: Linear(384,128)
    w2, b2 = linear(k2, D_H, D_Z)    # encoder.2: Linear(128,32)
    w3, b3 = linear(k3, D_Z, D_H)    # decoder.0: Linear(32,128)
    w4, b4 = linear(k4, D_H, D_IN)   # decoder.2: Linear(128,384)
    return (w1, b1, w2, b2, w3, b3, w4, b4)


def reference(x, params):
    (w1, b1, w2, b2, w3, b3, w4, b4) = params
    h1 = jnp.maximum(x @ w1 + b1, 0.0)
    z = h1 @ w2 + b2
    h2 = jnp.maximum(z @ w3 + b3, 0.0)
    xr = h2 @ w4 + b4
    return xr, z


if __name__ == "__main__":
    key = jax.random.PRNGKey(0)
    kx, kp = jax.random.split(key)

    B = 50  # small, non-multiple of the tile -> exercises padding/slicing
    x = jax.random.normal(kx, (B, D_IN), jnp.float32)
    params = init_params(kp)

    xr_ref, z_ref = reference(x, params)

    # exact f32 path
    xr32, z32 = dream_autoencoder(x, params, compute_dtype=jnp.float32)
    jax.block_until_ready((xr32, z32))
    assert xr32.shape == (B, D_IN) and z32.shape == (B, D_Z)
    assert jnp.allclose(z32, z_ref, atol=1e-4, rtol=1e-4)
    assert jnp.allclose(xr32, xr_ref, atol=1e-4, rtol=1e-4)

    # bf16 streaming path (default, memory-bandwidth optimized)
    xr16, z16 = dream_autoencoder(x, params)
    jax.block_until_ready((xr16, z16))
    assert xr16.shape == (B, D_IN) and z16.shape == (B, D_Z)
    assert jnp.allclose(z16, z_ref, atol=5e-2, rtol=5e-2)
    assert jnp.allclose(xr16, xr_ref, atol=5e-2, rtol=5e-2)

    print("KERNEL_OK")
</pallas_src>

<mosaic_0001>
module attributes {stable_mosaic.version = 11 : i64} {
  func.func @_ae_kernel(%arg0: i32, %arg1: memref<8x384xf32, #tpu.memory_space<vmem>>, %arg2: memref<384x128xf32, #tpu.memory_space<vmem>>, %arg3: memref<1x128xf32, #tpu.memory_space<vmem>>, %arg4: memref<128x32xf32, #tpu.memory_space<vmem>>, %arg5: memref<1x32xf32, #tpu.memory_space<vmem>>, %arg6: memref<128x128xf32, #tpu.memory_space<vmem>>, %arg7: memref<1x128xf32, #tpu.memory_space<vmem>>, %arg8: memref<128x384xf32, #tpu.memory_space<vmem>>, %arg9: memref<1x384xf32, #tpu.memory_space<vmem>>, %arg10: memref<8x384xf32, #tpu.memory_space<vmem>>, %arg11: memref<8x32xf32, #tpu.memory_space<vmem>>) attributes {dimension_semantics = [#tpu.dimension_semantics<parallel>], iteration_bounds = array<i64: 7>, scalar_prefetch = 0 : i64, scratch_operands = 0 : i64, tpu.core_type = #tpu.core_type<tc>, window_params = [{transform_indices = @transform_0, window_bounds = array<i64: 8, 384>}, {pipeline_mode = #tpu.pipeline_mode<synchronous>, transform_indices = @transform_1, window_bounds = array<i64: 384, 128>}, {pipeline_mode = #tpu.pipeline_mode<synchronous>, transform_indices = @transform_2, window_bounds = array<i64: 1, 128>}, {pipeline_mode = #tpu.pipeline_mode<synchronous>, transform_indices = @transform_3, window_bounds = array<i64: 128, 32>}, {pipeline_mode = #tpu.pipeline_mode<synchronous>, transform_indices = @transform_4, window_bounds = array<i64: 1, 32>}, {pipeline_mode = #tpu.pipeline_mode<synchronous>, transform_indices = @transform_5, window_bounds = array<i64: 128, 128>}, {pipeline_mode = #tpu.pipeline_mode<synchronous>, transform_indices = @transform_6, window_bounds = array<i64: 1, 128>}, {pipeline_mode = #tpu.pipeline_mode<synchronous>, transform_indices = @transform_7, window_bounds = array<i64: 128, 384>}, {pipeline_mode = #tpu.pipeline_mode<synchronous>, transform_indices = @transform_8, window_bounds = array<i64: 1, 384>}, {transform_indices = @transform_9, window_bounds = array<i64: 8, 384>}, {transform_indices = @transform_10, window_bounds = array<i64: 8, 32>}]} {
    %c0 = arith.constant 0 : index
    %c0_0 = arith.constant 0 : index
    %0 = vector.load %arg1[%c0, %c0_0] : memref<8x384xf32, #tpu.memory_space<vmem>>, vector<8x384xf32>
    %c0_1 = arith.constant 0 : index
    %c0_2 = arith.constant 0 : index
    %1 = vector.load %arg2[%c0_1, %c0_2] : memref<384x128xf32, #tpu.memory_space<vmem>>, vector<384x128xf32>
    %cst = arith.constant dense<0.000000e+00> : vector<8x128xf32>
    %2 = tpu.matmul %0, %1, %cst {dimension_numbers = #tpu.dot_dimension_numbers<[1], [0], [0], [1], [0, 0, 1, 1], [], []>} : vector<8x384xf32>, vector<384x128xf32>, vector<8x128xf32> -> vector<8x128xf32>
    %c0_3 = arith.constant 0 : index
    %c0_4 = arith.constant 0 : index
    %3 = vector.load %arg3[%c0_3, %c0_4] : memref<1x128xf32, #tpu.memory_space<vmem>>, vector<1x128xf32>
    %4 = vector.broadcast %3 : vector<1x128xf32> to vector<8x128xf32>
    %5 = arith.addf %2, %4 : vector<8x128xf32>
    %cst_5 = arith.constant 0.000000e+00 : f32
    %6 = vector.broadcast %cst_5 : f32 to vector<8x128xf32>
    %7 = arith.maximumf %5, %6 : vector<8x128xf32>
    %c0_6 = arith.constant 0 : index
    %c0_7 = arith.constant 0 : index
    %8 = vector.load %arg4[%c0_6, %c0_7] : memref<128x32xf32, #tpu.memory_space<vmem>>, vector<128x32xf32>
    %cst_8 = arith.constant dense<0.000000e+00> : vector<8x32xf32>
    %9 = tpu.matmul %7, %8, %cst_8 {dimension_numbers = #tpu.dot_dimension_numbers<[1], [0], [0], [1], [0, 0, 1, 1], [], []>} : vector<8x128xf32>, vector<128x32xf32>, vector<8x32xf32> -> vector<8x32xf32>
    %c0_9 = arith.constant 0 : index
    %c0_10 = arith.constant 0 : index
    %10 = vector.load %arg5[%c0_9, %c0_10] : memref<1x32xf32, #tpu.memory_space<vmem>>, vector<1x32xf32>
    %11 = vector.broadcast %10 : vector<1x32xf32> to vector<8x32xf32>
    %12 = arith.addf %9, %11 : vector<8x32xf32>
    %c0_11 = arith.constant 0 : index
    %c0_12 = arith.constant 0 : index
    %13 = vector.load %arg6[%c0_11, %c0_12] : memref<128x128xf32, #tpu.memory_space<vmem>>, vector<128x128xf32>
    %cst_13 = arith.constant dense<0.000000e+00> : vector<8x128xf32>
    %14 = tpu.matmul %7, %13, %cst_13 {dimension_numbers = #tpu.dot_dimension_numbers<[1], [0], [0], [1], [0, 0, 1, 1], [], []>} : vector<8x128xf32>, vector<128x128xf32>, vector<8x128xf32> -> vector<8x128xf32>
    %c0_14 = arith.constant 0 : index
    %c0_15 = arith.constant 0 : index
    %15 = vector.load %arg7[%c0_14, %c0_15] : memref<1x128xf32, #tpu.memory_space<vmem>>, vector<1x128xf32>
    %16 = vector.broadcast %15 : vector<1x128xf32> to vector<8x128xf32>
    %17 = arith.addf %14, %16 : vector<8x128xf32>
    %cst_16 = arith.constant 0.000000e+00 : f32
    %18 = vector.broadcast %cst_16 : f32 to vector<8x128xf32>
    %19 = arith.maximumf %17, %18 : vector<8x128xf32>
    %c0_17 = arith.constant 0 : index
    %c0_18 = arith.constant 0 : index
    %20 = vector.load %arg8[%c0_17, %c0_18] : memref<128x384xf32, #tpu.memory_space<vmem>>, vector<128x384xf32>
    %cst_19 = arith.constant dense<0.000000e+00> : vector<8x384xf32>
    %21 = tpu.matmul %19, %20, %cst_19 {dimension_numbers = #tpu.dot_dimension_numbers<[1], [0], [0], [1], [0, 0, 1, 1], [], []>} : vector<8x128xf32>, vector<128x384xf32>, vector<8x384xf32> -> vector<8x384xf32>
    %c0_20 = arith.constant 0 : index
    %c0_21 = arith.constant 0 : index
    %22 = vector.load %arg9[%c0_20, %c0_21] : memref<1x384xf32, #tpu.memory_space<vmem>>, vector<1x384xf32>
    %23 = vector.broadcast %22 : vector<1x384xf32> to vector<8x384xf32>
    %24 = arith.addf %21, %23 : vector<8x384xf32>
    %c0_22 = arith.constant 0 : index
    %c0_23 = arith.constant 0 : index
    %25 = vector.load %arg11[%c0_22, %c0_23] : memref<8x32xf32, #tpu.memory_space<vmem>>, vector<8x32xf32>
    tpu.vector_store %arg11[%c0_22, %c0_23], %12 {strides = array<i32>} : memref<8x32xf32, #tpu.memory_space<vmem>>, vector<8x32xf32>,
    %c0_24 = arith.constant 0 : index
    %c0_25 = arith.constant 0 : index
    %26 = vector.load %arg10[%c0_24, %c0_25] : memref<8x384xf32, #tpu.memory_space<vmem>>, vector<8x384xf32>
    tpu.vector_store %arg10[%c0_24, %c0_25], %24 {strides = array<i32>} : memref<8x384xf32, #tpu.memory_space<vmem>>, vector<8x384xf32>,
    return
  }
  func.func @transform_0(%arg0: i32) -> (i32, i32) {
    %c0_i32 = arith.constant 0 : i32
    %c0_i32_0 = arith.constant 0 : i32
    return %arg0, %c0_i32 : i32, i32
  }
  func.func @transform_1(%arg0: i32) -> (i32, i32) {
    %c0_i32 = arith.constant 0 : i32
    %c0_i32_0 = arith.constant 0 : i32
    %c0_i32_1 = arith.constant 0 : i32
    return %c0_i32, %c0_i32_0 : i32, i32
  }
  func.func @transform_2(%arg0: i32) -> (i32, i32) {
    %c0_i32 = arith.constant 0 : i32
    %c0_i32_0 = arith.constant 0 : i32
    %c0_i32_1 = arith.constant 0 : i32
    return %c0_i32, %c0_i32_0 : i32, i32
  }
  func.func @transform_3(%arg0: i32) -> (i32, i32) {
    %c0_i32 = arith.constant 0 : i32
    %c0_i32_0 = arith.constant 0 : i32
    %c0_i32_1 = arith.constant 0 : i32
    return %c0_i32, %c0_i32_0 : i32, i32
  }
  func.func @transform_4(%arg0: i32) -> (i32, i32) {
    %c0_i32 = arith.constant 0 : i32
    %c0_i32_0 = arith.constant 0 : i32
    %c0_i32_1 = arith.constant 0 : i32
    return %c0_i32, %c0_i32_0 : i32, i32
  }
  func.func @transform_5(%arg0: i32) -> (i32, i32) {
    %c0_i32 = arith.constant 0 : i32
    %c0_i32_0 = arith.constant 0 : i32
    %c0_i32_1 = arith.constant 0 : i32
    return %c0_i32, %c0_i32_0 : i32, i32
  }
  func.func @transform_6(%arg0: i32) -> (i32, i32) {
    %c0_i32 = arith.constant 0 : i32
    %c0_i32_0 = arith.constant 0 : i32
    %c0_i32_1 = arith.constant 0 : i32
    return %c0_i32, %c0_i32_0 : i32, i32
  }
  func.func @transform_7(%arg0: i32) -> (i32, i32) {
    %c0_i32 = arith.constant 0 : i32
    %c0_i32_0 = arith.constant 0 : i32
    %c0_i32_1 = arith.constant 0 : i32
    return %c0_i32, %c0_i32_0 : i32, i32
  }
  func.func @transform_8(%arg0: i32) -> (i32, i32) {
    %c0_i32 = arith.constant 0 : i32
    %c0_i32_0 = arith.constant 0 : i32
    %c0_i32_1 = arith.constant 0 : i32
    return %c0_i32, %c0_i32_0 : i32, i32
  }
  func.func @transform_9(%arg0: i32) -> (i32, i32) {
    %c0_i32 = arith.constant 0 : i32
    %c0_i32_0 = arith.constant 0 : i32
    return %arg0, %c0_i32 : i32, i32
  }
  func.func @transform_10(%arg0: i32) -> (i32, i32) {
    %c0_i32 = arith.constant 0 : i32
    %c0_i32_0 = arith.constant 0 : i32
    return %arg0, %c0_i32 : i32, i32
  }
}

</mosaic_0001>

<bundles_post_ra>
// kernel: tpu_custom_call.1
= control target key start
LH: loop header
LB: loop body
LE: loop exit
PB: predicated region body
PF: predicated region fallthrough
CT: control target
= control target key end

     0   :  { %s2057_s0 = inlined_call_operand.hbm [shape: f32[56,384], index: 0, kind: input, shape index: {}]   ;;  %s2058_s1 = inlined_call_operand.hbm [shape: f32[384,128], index: 1, kind: input, shape index: {}]   ;;  %s2059_s2 = inlined_call_operand.vmem [shape: f32[1,128], index: 2, kind: input, shape index: {}]   ;;  %s2060_s3 = inlined_call_operand.vmem [shape: f32[128,32], index: 3, kind: input, shape index: {}]   ;;  %s2061_s4 = inlined_call_operand.vmem [shape: f32[1,32], index: 4, kind: input, shape index: {}]   ;;  %s2062_s5 = inlined_call_operand.vmem [shape: f32[128,128], index: 5, kind: input, shape index: {}]   ;;  %s2063_s6 = inlined_call_operand.vmem [shape: f32[1,128], index: 6, kind: input, shape index: {}]   ;;  %s2064_s7 = inlined_call_operand.hbm [shape: f32[128,384], index: 7, kind: input, shape index: {}]   ;;  %s2065_s8 = inlined_call_operand.vmem [shape: f32[1,384], index: 8, kind: input, shape index: {}]   ;;  %s2066_s9 = inlined_call_operand.hbm [shape: f32[56,384], index: 9, kind: output, shape index: {0}]   ;;  %s2067_s10 = inlined_call_operand.vmem [shape: f32[56,32], index: 10, kind: output, shape index: {1}]  }
   0x1   :  { %2075 = sst [smem:[#allocation15_spill]] %s2058_s1 }
   0x2   :  { %2076 = sst [smem:[#allocation16_spill]] %s2064_s7 }
   0x3   :  { %16 = vsyncpa [#allocation3], 0 }
   0x4   :  { %18 = vsyncpa [#allocation3 + $0x1], 0 }
   0x5   :  { %19 = vsyncpa [#allocation6], 0 }
   0x6   :  { %20 = vsyncpa [#allocation4], 0 }
   0x7   :  { %22 = vsyncpa [#allocation4 + $0x1], 0  ;;  %s1699_s13 = smov 0   ;;  %s1701_s14 = smov 0  }
   0x8   :  { %s1703_s15 = smov 0   ;;  %s1705_s16 = smov 0  }
   0x9 LB: > { %2077 = sst [smem:[#allocation12_spill]] %s1628_s15  ;;  %s1720_s17 = sadd.s32 4294967295, %s1632_s16   ;;  %s1632_s16 = sphi %s1705_s16, %s2095_s16   ;;  %s1628_s15 = sphi %s1703_s15, %s2097_s15   ;;  %s1624_s14 = sphi %s1701_s14, %s2099_s14   ;;  %s1620_s13 = sphi %s1699_s13, %s2098_s13  }
   0xa   : > { %s1148_s18 = sadd.s32 4294967294, %s1632_s16   ;;  %p48_p0 = scmp.ne.s32.totalorder %s1624_s14, %s1620_s13 }
   0xb   : > { %p2068_p1 = scmp.eq.s32.totalorder %s1720_s17, 0  ;;  %p246_p3 = scmp.eq.s32.totalorder %s1148_s18, 6 }
   0xc   : > { %p1149_p5 = scmp.ge.s32.totalorder %s1632_s16, 1  ;;  %p279_p7 = scmp.lt.s32.totalorder %s1632_s16, 8 }
   0xd   : > { %p1729_p4 = por %p2068_p1, %p48_p0  ;;  %p1734_p6 = por %p246_p3, %p48_p0 }
   0xe   : > { %p1739_p8 = pnand %p1149_p5, %p279_p7  ;;  %s1634_s22 = smov [#allocation5]  }
   0xf   : > { %s2078_s19 = scalar_select %p1729_p4, 1, 0 }
  0x10   : > { %s2079_s20 = scalar_select %p1734_p6, 1, 0 }
  0x11   : > { %s2080_s21 = scalar_select %p1739_p8, 1, 0 }
  0x12   : > { %s291_s23 = sshll.u32 %s1634_s22, 4  ;;  %p1423_p9 = pneg %p1739_p8  ;;  %s292_s23 = int_to_ptr.vmem [resolvable:$true] %s291_s23 }
  0x13   : > { %s1635_s25 = smov [#allocation7]   ;;  %s1495_s27 = scalar_lea.vmem %s292_s23, 6144 }
  0x14   : > { %p1747_p10 = pnand %p1423_p9, %p2068_p1  ;;  %s319_s26 = sshll.u32 %s1635_s25, 4  ;;  %s320_s26 = int_to_ptr.vmem [resolvable:$true] %s319_s26 }
  0x15   : > { %p1496_p12 = scmp.ne.s32.totalorder %s292_s23, %s1495_s27  ;;  %p1503_p3 = scmp.lt.s32.totalorder %s292_s23, %s292_s23 }
  0x16   : > { %p1486_p11 = pneg %p1747_p10  ;;  %p1504_p5 = scmp.lt.s32.totalorder %s1495_s27, %s1495_s27 }
  0x18   : > { %p1498_p13 = pnand %p1496_p12, %p1486_p11  ;;  %p1505_p7 = por %p1504_p5, %p1503_p3 }
  0x1a   : > { %p1499_p0 = pneg %p1498_p13 }
  0x1c   : > { %p1506_p9 = pnand %p1505_p7, %p1499_p0 }
  0x1e   : > { %1509 = shalt.err (!%p1506_p9)
}
  0x1f   : > { %s1636_s28 = smov 128   ;;  %s1637_s29 = smov 8  }
  0x20   : > { %s2082_s1 = sld [smem:[#allocation15_spill]]  ;;  %s1521_s12 = scalar_lea.vmem %s320_s26, 6144 }
  0x21   : > { %p1522_p1 = scmp.ne.s32.totalorder %s320_s26, %s1521_s12  ;;  %p1529_p2 = scmp.lt.s32.totalorder %s320_s26, %s320_s26 }
  0x22   : > { %p1530_p6 = scmp.lt.s32.totalorder %s1521_s12, %s1521_s12 }
  0x23   : > { %p1524_p12 = pnand %p1522_p1, %p1486_p11 }
  0x24   : > { %p1531_p3 = por %p1530_p6, %p1529_p2 }
  0x25   : > { %p1525_p13 = pneg %p1524_p12 }
  0x26   : > { %1426 = dma.hbm_to_vmem [thread:$0]  (!%p1747_p10), %s2082_s1, 6144, %s292_s23, [#allocation6], %s1636_s28, %s1636_s28, %s1637_s29  }
  0x27   : > { %p1532_p0 = pnand %p1531_p3, %p1525_p13 }
  0x29   : > { %1535 = shalt.err (!%p1532_p0)
}
  0x2a   : > { %s1638_s18 = smov 384   ;;  %s1639_s22 = smov 24  }
  0x2b   : > { %s2083_s7 = sld [smem:[#allocation16_spill]]  ;;  %s1770_s27 = sadd.s32 1, %s1632_s16  }
  0x2c   : > { %2084 = sst [smem:[#allocation13_spill]] %s1770_s27  ;;  %s32_s28 = ssub.s32 %s1632_s16, %s1770_s27 }
  0x2d   : > { %p33_p1 = scmp.eq.s32.totalorder %s32_s28, 0  ;;  %s35_s29 = sadd.s32 1, %s1628_s15 }
  0x2e   : > { %p42_p2 = scmp.ne.s32.totalorder %s1628_s15, %s1624_s14  ;;  %p43_p6 = scmp.eq.s32.totalorder %s1632_s16, 0 }
  0x2f   : > { %s1779_s30 = scalar_select %p33_p1, %s1628_s15, %s35_s29  }
  0x30   : > { %p44_p11 = por %p43_p6, %p42_p2  ;;  %p2086_p5 = scmp.eq.s32.totalorder %s1720_s17, 6 }
  0x31   : > { %1429 = dma.hbm_to_vmem [thread:$0]  (!%p1747_p10), %s2083_s7, 6144, %s320_s26, [#allocation6], %s1638_s18, %s1638_s18, %s1639_s22  }
  0x32   : > { %2085 = sst [smem:[#allocation14_spill]] %s1779_s30  ;;  %p1783_p7 = por %p2086_p5, %p42_p2 }
  0x33   : > { %p1440_p9 = scmp.lt.s32.totalorder %s1632_s16, 7  ;;  %s336_s24 = sand.u32 1, %s1628_s15  }
  0x34   : > { %s2087_s11 = scalar_select %p1783_p7, 1, 0 }
  0x35   : > { %s1407_s12 = smul.u32 24, %s336_s24  ;;  %p1790_p10 = pnand %p1440_p9, %p44_p11 }
  0x36   : > { %s1408_s26 = smul.u32 384, %s1632_s16  ;;  %s337_s1 = scalar_lea.sflag [#allocation3], %s336_s24 }
  0x37   : > { %s340_s28 = scalar_lea.vmem [#allocation2], %s1407_s12  ;;  %p1538_p13 = pneg %p1790_p10 }
  0x38   : > { %s1797_s25 = scalar_lea.hbm %s2057_s0, %s1408_s26  ;;  %s348_s29 = sshll.u32 %s340_s28, 4  ;;  %s349_s29 = int_to_ptr.vmem [resolvable:$true] %s348_s29 }
  0x39   : > { %s1536_s7 = scalar_lea.hbm %s1797_s25, 384  ;;  %s1541_s22 = scalar_lea.hbm %s2057_s0, 2688 }
  0x3a   : > { %p1537_p12 = scmp.ne.s32.totalorder %s1797_s25, %s1536_s7  ;;  %p1542_p1 = scmp.lt.s32.totalorder %s1797_s25, %s2057_s0 }
  0x3b   : > { %p1543_p2 = scmp.lt.s32.totalorder %s1541_s22, %s1536_s7 }
  0x3c   : > { %p1539_p3 = pnand %p1538_p13, %p1537_p12 }
  0x3d   : > { %p1544_p6 = por %p1543_p2, %p1542_p1 }
  0x3e   : > { %p1540_p0 = pneg %p1539_p3 }
  0x40   : > { %p1545_p11 = pnand %p1544_p6, %p1540_p0 }
  0x42   : > { %1548 = shalt.err (!%p1545_p11)
}
  0x43   : > { %s1549_s12 = scalar_lea.vmem %s349_s29, 384  ;;  %s1640_s24 = smov [#allocation2]  }
  0x44   : > { %p1550_p5 = scmp.ne.s32.totalorder %s349_s29, %s1549_s12  ;;  %s1554_s28 = sshll.u32 %s1640_s24, 4  ;;  %s1555_s28 = int_to_ptr.vmem [resolvable:$false] %s1554_s28 }
  0x45   : > { %s1556_s27 = scalar_lea.vmem %s1555_s28, 768  ;;  %p1557_p12 = scmp.lt.s32.totalorder %s349_s29, %s1555_s28 }
  0x46   : > { %p1552_p9 = pnand %p1550_p5, %p1538_p13  ;;  %p1558_p3 = scmp.lt.s32.totalorder %s1556_s27, %s1549_s12 }
  0x48   : > { %p1553_p7 = pneg %p1552_p9  ;;  %p1559_p4 = por %p1558_p3, %p1557_p12 }
  0x4a   : > { %p1560_p8 = pnand %p1559_p4, %p1553_p7 }
  0x4c   : > { %1563 = shalt.err (!%p1560_p8)
}
  0x4d   : > { %1433 = dma.hbm_to_vmem [thread:$0]  (!%p1790_p10), %s1797_s25, 384, %s349_s29, %s337_s1  }
  0x4e   : > { %p2089_p0 = scmp.ne.s32.totalorder %s2080_s21, 0 }
  0x4f   : > { %s1816_s7 = sand.u32 (!%p2089_p0), 1, %s1624_s14   ;;  %p2090_p4 = scmp.ne.s32.totalorder (!%p2089_p0), %s2078_s19, 0 }
  0x50   : > { %357 = sbr.rel (%p2089_p0) target bundleno = 733 (0x2dd), region = 56  ;;  %s360_s30 = scalar_lea.sflag (!%p2089_p0), [#allocation3], %s1816_s7 }
  0x51   : > { %s1409_s15 = smul.u32 (!%p2089_p0), 24, %s1816_s7 }
  0x53   : > { %s1822_s27 = scalar_lea.vmem (!%p2089_p0), [#allocation2], %s1409_s15 }
  0x55   : > { %1607 = dma.done.wait (%p2090_p4), %s360_s30, 384  }
  0x56   : > { %1609 = vsyncadd (%p2090_p4), %s360_s30, 4294966912  ;;  %p2091_p8 = scmp.eq.s32.totalorder %s1720_s17, 0 }
  0x58   : > { %1611 = dma.done.wait (%p2091_p8), [#allocation6], 12288   ;;  %p2092_p7 = pmov %p2091_p8 }
  0x59   : > { %v1641_v0 = vmov 0.0   ;;  %vm1642_vm0 = vmmov 0   ;;  %v450_v1 = vld [vmem:[#allocation5 + $0xf8] sm:$0xff]  ;;  %v449_v3 = vld [vmem:[#allocation5 + $0xf0] sm:$0xff]  ;;  %v448_v5 = vld [vmem:[#allocation5 + $0xe8] sm:$0xff]  ;;  %p412_p10 = scmp.lt.s32.totalorder %s1720_s17, 6 }
  0x5a   : > { %1613 = vsyncadd (%p2092_p7), [#allocation6], 4294955008  ;;  %1267 = vmatprep.subr.mxu1 %v1641_v0  ;;  %1299 = vmatprep.mubr.msk.f32.mxu1 %vm1642_vm0, %v1641_v0  ;;  %v434_v2 = vld [vmem:[#allocation5 + $0x78] sm:$0xff]  ;;  %v433_v4 = vld [vmem:[#allocation5 + $0x70] sm:$0xff]  ;;  %vm1008_vm1 = vcmask 261120   ;;  %s1410_s23 = smul.u32 384, %s1720_s17 }
  0x5b   : > { %1164 = vmatprep.subr.mxu0 %v450_v1  ;;  %v466_v6 = vld [vmem:[#allocation5 + $0x178] sm:$0xff]  ;;  %v432_v7 = vld [vmem:[#allocation5 + $0x68] sm:$0xff]  ;;  %v465_v8 = vld [vmem:[#allocation5 + $0x170] sm:$0xff]  ;;  %s413_s24 = scalar_select %p412_p10, %s1720_s17, 6 }
  0x5c   : > { %1165 = vmatpush3.msra.mxu0 %v434_v2  ;;  %1268 = vmatpush3.msra.mxu1 %v466_v6  ;;  %v447_v9 = vld [vmem:[#allocation5 + $0xe0] sm:$0xff]  ;;  %v464_v10 = vld [vmem:[#allocation5 + $0x168] sm:$0xff]  ;;  %v446_v12 = vld [vmem:[#allocation5 + $0xd8] sm:$0xff]  ;;  %s405_s26 = scalar_lea.vmem [#allocation8], %s1409_s15  ;;  %s1030_s30 = scalar_lea.hbm %s2066_s9, %s1410_s23 }
  0x5d   : > { %1166 = vmatprep.subr.mxu0 %v449_v3  ;;  %1269 = vmatprep.subr.mxu1 %v1641_v0  ;;  %v431_v11 = vld [vmem:[#allocation5 + $0x60] sm:$0xff]  ;;  %v430_v14 = vld [vmem:[#allocation5 + $0x58] sm:$0xff]  ;;  %v445_v15 = vld [vmem:[#allocation5 + $0xd0] sm:$0xff]  ;;  %s1157_s28 = sshll.u32 %s413_s24, 3  ;;  %s1032_s12 = sshll.u32 %s405_s26, 4  ;;  %s1033_s12 = int_to_ptr.vmem [resolvable:$true] %s1032_s12 }
  0x5e   : > { %1167 = vmatpush3.msra.mxu0 %v433_v4  ;;  %1270 = vmatpush3.msra.mxu1 %v465_v8  ;;  %v463_v13 = vld [vmem:[#allocation5 + $0x160] sm:$0xff]  ;;  %v462_v16 = vld [vmem:[#allocation5 + $0x158] sm:$0xff]  ;;  %v429_v17 = vld [vmem:[#allocation5 + $0x50] sm:$0xff]  ;;  %s415_s25 = scalar_lea.vmem %s2067_s10, %s1157_s28  ;;  %s1014_s17 = scalar_lea.sflag [#allocation4], %s1816_s7 }
  0x5f   : > { %1168 = vmatprep.subr.mxu0 %v448_v5  ;;  %1271 = vmatprep.subr.mxu1 %v1641_v0  ;;  %v444_v18 = vld [vmem:[#allocation5 + $0xc8] sm:$0xff]  ;;  %v461_v19 = vld [vmem:[#allocation5 + $0x150] sm:$0xff]  ;;  %v443_v21 = vld [vmem:[#allocation5 + $0xc0] sm:$0xff]  ;;  %p2093_p1 = scmp.ne.s32.totalorder %s2087_s11, 0  ;;  %s1643_s15 = smov [#allocation8]  }
  0x60   : > { %1169 = vmatpush3.msra.mxu0 %v432_v7  ;;  %1272 = vmatpush3.msra.mxu1 %v464_v10  ;;  %v428_v20 = vld [vmem:[#allocation5 + $0x48] sm:$0xff]  ;;  %v427_v23 = vld [vmem:[#allocation5 + $0x40] sm:$0xff]  ;;  %v442_v24 = vld [vmem:[#allocation5 + $0xb8] sm:$0xff]  ;;  %s1568_s1 = sshll.u32 %s1643_s15, 4  ;;  %s1569_s1 = int_to_ptr.vmem [resolvable:$false] %s1568_s1 }
  0x61   : > { %1170 = vmatprep.subr.mxu0 %v447_v9  ;;  %1273 = vmatprep.subr.mxu1 %v1641_v0  ;;  %v460_v22 = vld [vmem:[#allocation5 + $0x148] sm:$0xff]  ;;  %v459_v25 = vld [vmem:[#allocation5 + $0x140] sm:$0xff]  ;;  %v426_v26 = vld [vmem:[#allocation5 + $0x38] sm:$0xff]  ;;  %s1570_s19 = scalar_lea.vmem %s1569_s1, 768  ;;  %p1571_p11 = scmp.lt.s32.totalorder %s1033_s12, %s1569_s1 }
  0x62   : > { %1171 = vmatpush3.msra.mxu0 %v431_v11  ;;  %1274 = vmatpush3.msra.mxu1 %v463_v13  ;;  %v441_v27 = vld [vmem:[#allocation5 + $0xb0] sm:$0xff]  ;;  %v458_v28 = vld [vmem:[#allocation5 + $0x138] sm:$0xff]  ;;  %v440_v30 = vld [vmem:[#allocation5 + $0xa8] sm:$0xff] }
  0x63   : > { %1172 = vmatprep.subr.mxu0 %v446_v12  ;;  %1275 = vmatprep.subr.mxu1 %v1641_v0  ;;  %v425_v29 = vld [vmem:[#allocation5 + $0x30] sm:$0xff]  ;;  %v424_v32 = vld [vmem:[#allocation5 + $0x28] sm:$0xff]  ;;  %v439_v33 = vld [vmem:[#allocation5 + $0xa0] sm:$0xff] }
  0x64   : > { %1173 = vmatpush3.msra.mxu0 %v430_v14  ;;  %1276 = vmatpush3.msra.mxu1 %v462_v16  ;;  %v457_v31 = vld [vmem:[#allocation5 + $0x130] sm:$0xff]  ;;  %v456_v34 = vld [vmem:[#allocation5 + $0x128] sm:$0xff]  ;;  %v423_v35 = vld [vmem:[#allocation5 + $0x20] sm:$0xff] }
  0x65   : > { %1174 = vmatprep.subr.mxu0 %v445_v15  ;;  %1277 = vmatprep.subr.mxu1 %v1641_v0  ;;  %v438_v36 = vld [vmem:[#allocation5 + $0x98] sm:$0xff]  ;;  %v455_v37 = vld [vmem:[#allocation5 + $0x120] sm:$0xff]  ;;  %v437_v39 = vld [vmem:[#allocation5 + $0x90] sm:$0xff] }
  0x66   : > { %1175 = vmatpush3.msra.mxu0 %v429_v17  ;;  %1278 = vmatpush3.msra.mxu1 %v461_v19  ;;  %v422_v38 = vld [vmem:[#allocation5 + $0x18] sm:$0xff]  ;;  %v421_v41 = vld [vmem:[#allocation5 + $0x10] sm:$0xff]  ;;  %v436_v42 = vld [vmem:[#allocation5 + $0x88] sm:$0xff] }
  0x67   : > { %1176 = vmatprep.subr.mxu0 %v444_v18  ;;  %1279 = vmatprep.subr.mxu1 %v1641_v0  ;;  %v454_v40 = vld [vmem:[#allocation5 + $0x118] sm:$0xff]  ;;  %v420_v44 = vld [vmem:[#allocation5 + $0x8] sm:$0xff]  ;;  %v453_v45 = vld [vmem:[#allocation5 + $0x110] sm:$0xff] }
  0x68   : > { %1177 = vmatpush3.msra.mxu0 %v428_v20  ;;  %1280 = vmatpush3.msra.mxu1 %v460_v22  ;;  %v417_v43 = vld [vmem:[%s1822_s27 + $0x8] sm:$0xff]  ;;  %v435_v46 = vld [vmem:[#allocation5 + $0x80] sm:$0xff]  ;;  %v452_v48 = vld [vmem:[#allocation5 + $0x108] sm:$0xff] }
  0x69   : > { %1178 = vmatprep.subr.mxu0 %v443_v21  ;;  %1281 = vmatprep.subr.mxu1 %v1641_v0  ;;  %v419_v47 = vld [vmem:[#allocation5] sm:$0xff]  ;;  %v416_v49 = vld [vmem:[%s1822_s27] sm:$0xff]  ;;  %v628_v56 = vld [vmem:[%s2060_s3 + $0x68] sm:$0xff] }
  0x6a   : > { %1179 = vmatpush3.msra.mxu0 %v427_v23  ;;  %1282 = vmatpush3.msra.mxu1 %v459_v25  ;;  %v451_v50 = vld [vmem:[#allocation5 + $0x100] sm:$0xff]  ;;  %v630_v52 = vld [vmem:[%s2060_s3 + $0x78] sm:$0xff]  ;;  %v721_v57 = vld [vmem:[%s2062_s5 + $0x68] sm:$0xff] }
  0x6b   : > { %1180 = vmatprep.subr.mxu0 %v442_v24  ;;  %1283 = vmatprep.subr.mxu1 %v1641_v0  ;;  %v418_v51 = vld [vmem:[%s1822_s27 + $0x10] sm:$0xff]  ;;  %v723_v53 = vld [vmem:[%s2062_s5 + $0x78] sm:$0xff]  ;;  %v627_v58 = vld [vmem:[%s2060_s3 + $0x60] sm:$0xff]  ;;  %s1564_s27 = scalar_lea.vmem %s1033_s12, 384 }
  0x6c   : > { %1181 = vmatpush3.msra.mxu0 %v426_v26  ;;  %1284 = vmatpush3.msra.mxu1 %v458_v28  ;;  %v629_v54 = vld [vmem:[%s2060_s3 + $0x70] sm:$0xff]  ;;  %v720_v59 = vld [vmem:[%s2062_s5 + $0x60] sm:$0xff]  ;;  %v626_v60 = vld [vmem:[%s2060_s3 + $0x58] sm:$0xff]  ;;  %p1565_p13 = scmp.ne.s32.totalorder %s1033_s12, %s1564_s27  ;;  %p1572_p5 = scmp.lt.s32.totalorder %s1570_s19, %s1564_s27 }
  0x6d   : > { %1182 = vmatprep.subr.mxu0 %v441_v27  ;;  %1285 = vmatprep.subr.mxu1 %v1641_v0  ;;  %v722_v55 = vld [vmem:[%s2062_s5 + $0x70] sm:$0xff]  ;;  %v719_v61 = vld [vmem:[%s2062_s5 + $0x58] sm:$0xff]  ;;  %v624_v1 = vld [vmem:[%s2060_s3 + $0x48] sm:$0xff] }
  0x6e   : > { %1183 = vmatpush3.msra.mxu0 %v425_v29  ;;  %1286 = vmatpush3.msra.mxu1 %v457_v31  ;;  %v625_v62 = vld [vmem:[%s2060_s3 + $0x50] sm:$0xff]  ;;  %v717_v2 = vld [vmem:[%s2062_s5 + $0x48] sm:$0xff]  ;;  %v623_v3 = vld [vmem:[%s2060_s3 + $0x40] sm:$0xff]  ;;  %p1566_p2 = pnand %p1565_p13, %p2093_p1  ;;  %p1573_p9 = por %p1572_p5, %p1571_p11 }
  0x6f   : > { %1184 = vmatprep.subr.mxu0 %v440_v30  ;;  %1287 = vmatprep.subr.mxu1 %v1641_v0  ;;  %v718_v63 = vld [vmem:[%s2062_s5 + $0x50] sm:$0xff]  ;;  %v716_v4 = vld [vmem:[%s2062_s5 + $0x40] sm:$0xff]  ;;  %v622_v5 = vld [vmem:[%s2060_s3 + $0x38] sm:$0xff] }
  0x70   : > { %1185 = vmatpush3.msra.mxu0 %v424_v32  ;;  %1288 = vmatpush3.msra.mxu1 %v456_v34  ;;  %v715_v6 = vld [vmem:[%s2062_s5 + $0x38] sm:$0xff]  ;;  %v621_v7 = vld [vmem:[%s2060_s3 + $0x30] sm:$0xff]  ;;  %v620_v9 = vld [vmem:[%s2060_s3 + $0x28] sm:$0xff]  ;;  %p1567_p6 = pneg %p1566_p2 }
  0x71   : > { %1186 = vmatprep.subr.mxu0 %v439_v33  ;;  %1289 = vmatprep.subr.mxu1 %v1641_v0  ;;  %v714_v8 = vld [vmem:[%s2062_s5 + $0x30] sm:$0xff]  ;;  %v713_v10 = vld [vmem:[%s2062_s5 + $0x28] sm:$0xff]  ;;  %v619_v11 = vld [vmem:[%s2060_s3 + $0x20] sm:$0xff] }
  0x72   : > { %1187 = vmatpush3.msra.mxu0 %v423_v35  ;;  %1290 = vmatpush3.msra.mxu1 %v455_v37  ;;  %v712_v12 = vld [vmem:[%s2062_s5 + $0x20] sm:$0xff]  ;;  %v618_v13 = vld [vmem:[%s2060_s3 + $0x18] sm:$0xff]  ;;  %v617_v15 = vld [vmem:[%s2060_s3 + $0x10] sm:$0xff]  ;;  %p1574_p12 = pnand %p1573_p9, %p1567_p6 }
  0x73   : > { %1188 = vmatprep.subr.mxu0 %v438_v36  ;;  %1291 = vmatprep.subr.mxu1 %v1641_v0  ;;  %v711_v14 = vld [vmem:[%s2062_s5 + $0x18] sm:$0xff]  ;;  %v710_v16 = vld [vmem:[%s2062_s5 + $0x10] sm:$0xff]  ;;  %v616_v17 = vld [vmem:[%s2060_s3 + $0x8] sm:$0xff] }
  0x74   : > { %1189 = vmatpush3.msra.mxu0 %v422_v38  ;;  %1292 = vmatpush3.msra.mxu1 %v454_v40  ;;  %v709_v18 = vld [vmem:[%s2062_s5 + $0x8] sm:$0xff]  ;;  %v615_v19 = vld [vmem:[%s2060_s3] sm:$0xff]  ;;  %v847_v31 = vld [vmem:[#allocation7 + $0x168] sm:$0xff] }
  0x75   : > { %1190 = vmatprep.subr.mxu0 %v437_v39  ;;  %1293 = vmatprep.subr.mxu1 %v1641_v0  ;;  %v708_v20 = vld [vmem:[%s2062_s5] sm:$0xff]  ;;  %v849_v32 = vld [vmem:[#allocation7 + $0x178] sm:$0xff]  ;;  %v846_v35 = vld [vmem:[#allocation7 + $0x160] sm:$0xff] }
  0x76   : > { %1191 = vmatpush3.msra.mxu0 %v421_v41  ;;  %538 = vmatprep.mubr.f32.mxu0 %v417_v43  ;;  %v848_v21 = vld [vmem:[#allocation7 + $0x170] sm:$0xff]  ;;  %v845_v33 = vld [vmem:[#allocation7 + $0x158] sm:$0xff]  ;;  %v842_v36 = vld [vmem:[#allocation7 + $0x140] sm:$0xff] }
  0x77   : > { %1192 = vmatprep.subr.mxu0 %v436_v42  ;;  %1294 = vmatpush3.msra.mxu1 %v453_v45  ;;  %v1158_v24 = vld [vmem:[%s2059_s2] ss:$0 sm:$0xff]  ;;  %v841_v37 = vld [vmem:[#allocation7 + $0x138] sm:$0xff]  ;;  %v843_v38 = vld [vmem:[#allocation7 + $0x148] sm:$0xff] }
  0x78   : > { %1193 = vmatpush3.msra.mxu0 %v420_v44  ;;  %1295 = vmatprep.subr.mxu1 %v1641_v0  ;;  %v844_v34 = vld [vmem:[#allocation7 + $0x150] sm:$0xff]  ;;  %v839_v39 = vld [vmem:[#allocation7 + $0x128] sm:$0xff]  ;;  %v838_v40 = vld [vmem:[#allocation7 + $0x120] sm:$0xff] }
  0x79   : > { %1194 = vmatprep.subr.mxu0 %v435_v46  ;;  %1296 = vmatpush3.msra.mxu1 %v452_v48  ;;  %v840_v41 = vld [vmem:[#allocation7 + $0x130] sm:$0xff]  ;;  %v835_v43 = vld [vmem:[#allocation7 + $0x108] sm:$0xff]  ;;  %v837_v44 = vld [vmem:[#allocation7 + $0x118] sm:$0xff] }
  0x7a   : > { %1195 = vmatpush3.msra.mxu0 %v419_v47  ;;  %1297 = vmatprep.subr.mxu1 %v1641_v0  ;;  %v836_v42 = vld [vmem:[#allocation7 + $0x110] sm:$0xff]  ;;  %v833_v45 = vld [vmem:[#allocation7 + $0xf8] sm:$0xff]  ;;  %v834_v47 = vld [vmem:[#allocation7 + $0x100] sm:$0xff] }
  0x7b   : > { %539 = vmatmul.mubr.f32.vlgmr.msra.gmra.mxu0 %v416_v49  ;;  %1298 = vmatpush3.msra.mxu1 %v451_v50  ;;  %v832_v46 = vld [vmem:[#allocation7 + $0xf0] sm:$0xff]  ;;  %v830_v48 = vld [vmem:[#allocation7 + $0xe0] sm:$0xff]  ;;  %v829_v49 = vld [vmem:[#allocation7 + $0xd8] sm:$0xff] }
  0x7c   : > { %1302 = vmatprep.subr.mxu0 %v1641_v0  ;;  %1300 = vmatmul.mubr.f32.vlgmr.msra.gmra.mxu1 %v418_v51  ;;  %v831_v50 = vld [vmem:[#allocation7 + $0xe8] sm:$0xff] }
  0x7d   : > { %1337 = vmatprep.subr.mxu1 %v1641_v0  ;;  %1303 = vmatpush3.msra.mxu0 %v630_v52  ;;  %v827_v51 = vld [vmem:[#allocation7 + $0xc8] sm:$0xff]  ;;  %v826_v52 = vld [vmem:[#allocation7 + $0xc0] sm:$0xff] }
  0x7e   : > { %1338 = vmatpush3.msra.mxu1 %v723_v53  ;;  %1304 = vmatprep.subr.mxu0 %v1641_v0  ;;  %v828_v53 = vld [vmem:[#allocation7 + $0xd0] sm:$0xff] }
  0x7f   : > { %1339 = vmatprep.subr.mxu1 %v1641_v0  ;;  %1305 = vmatpush3.msra.mxu0 %v629_v54  ;;  %v824_v54 = vld [vmem:[#allocation7 + $0xb0] sm:$0xff] }
  0x80   : > { %1340 = vmatpush3.msra.mxu1 %v722_v55  ;;  %1306 = vmatprep.subr.mxu0 %v1641_v0  ;;  %v823_v55 = vld [vmem:[#allocation7 + $0xa8] sm:$0xff] }
  0x81   : > { %1341 = vmatprep.subr.mxu1 %v1641_v0  ;;  %1307 = vmatpush3.msra.mxu0 %v628_v56  ;;  %v825_v56 = vld [vmem:[#allocation7 + $0xb8] sm:$0xff] }
  0x82   : > { %1342 = vmatpush3.msra.mxu1 %v721_v57  ;;  %1308 = vmatprep.subr.mxu0 %v1641_v0  ;;  %v821_v57 = vld [vmem:[#allocation7 + $0x98] sm:$0xff] }
  0x83   : > { %1343 = vmatprep.subr.mxu1 %v1641_v0  ;;  %1309 = vmatpush3.msra.mxu0 %v627_v58  ;;  %v820_v58 = vld [vmem:[#allocation7 + $0x90] sm:$0xff] }
  0x84   : > { %1344 = vmatpush3.msra.mxu1 %v720_v59  ;;  %1310 = vmatprep.subr.mxu0 %v1641_v0  ;;  %v822_v59 = vld [vmem:[#allocation7 + $0xa0] sm:$0xff] }
  0x85   : > { %1345 = vmatprep.subr.mxu1 %v1641_v0  ;;  %1311 = vmatpush3.msra.mxu0 %v626_v60  ;;  %v818_v60 = vld [vmem:[#allocation7 + $0x80] sm:$0xff] }
  0x86   : > { %1346 = vmatpush3.msra.mxu1 %v719_v61  ;;  %1312 = vmatprep.subr.mxu0 %v1641_v0  ;;  %v817_v61 = vld [vmem:[#allocation7 + $0x78] sm:$0xff] }
  0x87   : > { %1347 = vmatprep.subr.mxu1 %v1641_v0  ;;  %1313 = vmatpush3.msra.mxu0 %v625_v62  ;;  %v819_v62 = vld [vmem:[#allocation7 + $0x88] sm:$0xff] }
  0x88   : > { %1348 = vmatpush3.msra.mxu1 %v718_v63  ;;  %1314 = vmatprep.subr.mxu0 %v1641_v0  ;;  %v815_v63 = vld [vmem:[#allocation7 + $0x68] sm:$0xff] }
  0x89   : > { %1349 = vmatprep.subr.mxu1 %v1641_v0  ;;  %1315 = vmatpush3.msra.mxu0 %v624_v1  ;;  %v814_v1 = vld [vmem:[#allocation7 + $0x60] sm:$0xff] }
  0x8a   : > { %1350 = vmatpush3.msra.mxu1 %v717_v2  ;;  %1316 = vmatprep.subr.mxu0 %v1641_v0  ;;  %v816_v2 = vld [vmem:[#allocation7 + $0x70] sm:$0xff] }
  0x8b   : > { %1351 = vmatprep.subr.mxu1 %v1641_v0  ;;  %1317 = vmatpush3.msra.mxu0 %v623_v3  ;;  %v812_v3 = vld [vmem:[#allocation7 + $0x50] sm:$0xff] }
  0x8c   : > { %1352 = vmatpush3.msra.mxu1 %v716_v4  ;;  %1318 = vmatprep.subr.mxu0 %v1641_v0  ;;  %v811_v4 = vld [vmem:[#allocation7 + $0x48] sm:$0xff] }
  0x8d   : > { %1353 = vmatprep.subr.mxu1 %v1641_v0  ;;  %1319 = vmatpush3.msra.mxu0 %v622_v5  ;;  %v813_v5 = vld [vmem:[#allocation7 + $0x58] sm:$0xff] }
  0x8e   : > { %1354 = vmatpush3.msra.mxu1 %v715_v6  ;;  %1320 = vmatprep.subr.mxu0 %v1641_v0  ;;  %v809_v6 = vld [vmem:[#allocation7 + $0x38] sm:$0xff] }
  0x8f   : > { %1355 = vmatprep.subr.mxu1 %v1641_v0  ;;  %1321 = vmatpush3.msra.mxu0 %v621_v7  ;;  %v808_v7 = vld [vmem:[#allocation7 + $0x30] sm:$0xff] }
  0x90   : > { %1356 = vmatpush3.msra.mxu1 %v714_v8  ;;  %1322 = vmatprep.subr.mxu0 %v1641_v0  ;;  %v810_v8 = vld [vmem:[#allocation7 + $0x40] sm:$0xff] }
  0x91   : > { %1357 = vmatprep.subr.mxu1 %v1641_v0  ;;  %1334 = vmatprep.mubr.msk.f32.mxu0 %vm1642_vm0, %v1641_v0 }
  0x92   : > { %1369 = vmatprep.mubr.msk.f32.mxu1 %vm1642_vm0, %v1641_v0  ;;  %1323 = vmatpush3.msra.mxu0 %v620_v9  ;;  %v806_v9 = vld [vmem:[#allocation7 + $0x20] sm:$0xff] }
  0x93   : > { %1358 = vmatpush3.msra.mxu1 %v713_v10  ;;  %1324 = vmatprep.subr.mxu0 %v1641_v0  ;;  %v805_v10 = vld [vmem:[#allocation7 + $0x18] sm:$0xff] }
  0x94   : > { %1359 = vmatprep.subr.mxu1 %v1641_v0  ;;  %1325 = vmatpush3.msra.mxu0 %v619_v11  ;;  %v807_v11 = vld [vmem:[#allocation7 + $0x28] sm:$0xff] }
  0x95   : > { %1360 = vmatpush3.msra.mxu1 %v712_v12  ;;  %1326 = vmatprep.subr.mxu0 %v1641_v0  ;;  %v803_v12 = vld [vmem:[#allocation7 + $0x8] sm:$0xff] }
  0x96   : > { %1361 = vmatprep.subr.mxu1 %v1641_v0  ;;  %1327 = vmatpush3.msra.mxu0 %v618_v13  ;;  %v802_v13 = vld [vmem:[#allocation7] sm:$0xff] }
  0x97   : > { %1362 = vmatpush3.msra.mxu1 %v711_v14  ;;  %1328 = vmatprep.subr.mxu0 %v1641_v0  ;;  %v804_v14 = vld [vmem:[#allocation7 + $0x10] sm:$0xff] }
  0x98   : > { %1363 = vmatprep.subr.mxu1 %v1641_v0  ;;  %1329 = vmatpush3.msra.mxu0 %v617_v15  ;;  %v1159_v15 = vld [vmem:[%s2061_s4] ss:$0 sm:$0xff] }
  0x99   : > { %1364 = vmatpush3.msra.mxu1 %v710_v16  ;;  %1330 = vmatprep.subr.mxu0 %v1641_v0  ;;  %v1160_v16 = vld [vmem:[%s2063_s6] ss:$0 sm:$0xff] }
  0x9a   : > { %1365 = vmatprep.subr.mxu1 %v1641_v0  ;;  %1331 = vmatpush3.msra.mxu0 %v616_v17 }
  0x9b   : > { %1366 = vmatpush3.msra.mxu1 %v709_v18  ;;  %1332 = vmatprep.subr.mxu0 %v1641_v0 }
  0x9c   : > { %1367 = vmatprep.subr.mxu1 %v1641_v0  ;;  %1333 = vmatpush3.msra.mxu0 %v615_v19 }
  0x9d   : > { %1368 = vmatpush3.msra.mxu1 %v708_v20  ;;  %867 = vmatprep.subr.mxu0 %v848_v21 }
  0x9e   : > { %1372 = vmatprep.subr.mxu1 %v1641_v0 }
 0x13b   : > { %v1196_v22 = vpop.f32.mrf.mxu0 }
 0x13c   : > { %v610_v25 = vpop.f32.mrf.mxu1 }
 0x13d   : > { %v1197_v23 = vpop.f32.mrf.mxu0 }
 0x13e   : > { %v1198_v26 = vadd.f32 %v1197_v23, %v1196_v22  ;;  %v1301_v27 = vpop.f32.mrf.mxu1  ;;  %v852_v23 = vlaneseq }
 0x13f   : > { %v850_v27 = vld [vmem:[%s2065_s8] sm:$0x7] }
 0x140   : > { %v541_v28 = vadd.f32 %v1198_v26, %v1158_v24  ;;  %v853_v24 = vshrl.u32 %v852_v23, 7 }
 0x142   : > { %v611_v29 = vadd.f32 %v610_v25, %v541_v28  ;;  %v854_v25 = vsub.s32 0, %v853_v24  ;;  %v862_v26 = vsub.s32 2, %v853_v24  ;;  %v858_v28 = vsub.s32 1, %v853_v24 }
 0x144   : > { %v614_v30 = vmax.f32 %v611_v29, 0.0  ;;  %v855_v29 = vrot.slane %v850_v27, %v854_v25 }
 0x146   : > { %1335 = vmatmul.mubr.f32.vlgmr.msra.gmra.mxu0 %v614_v30  ;;  %1370 = vmatmul.mubr.f32.vlgmr.msra.gmra.mxu1 %v614_v30  ;;  %v863_v30 = vrot.slane %v850_v27, %v862_v26 }
 0x147   : > { %868 = vmatpush1.msra.mxu0 %v847_v31  ;;  %1373 = vmatpush3.msra.mxu1 %v849_v32  ;;  %v859_v31 = vrot.slane %v850_v27, %v858_v28 }
 0x148   : > { %869 = vmatprep.subr.mxu0 %v845_v33  ;;  %1374 = vmatprep.subr.mxu1 %v1641_v0 }
 0x149   : > { %870 = vmatpush1.msra.mxu0 %v844_v34  ;;  %1375 = vmatpush3.msra.mxu1 %v846_v35 }
 0x14a   : > { %871 = vmatprep.subr.mxu0 %v842_v36  ;;  %1376 = vmatprep.subr.mxu1 %v1641_v0 }
 0x14b   : > { %872 = vmatpush1.msra.mxu0 %v841_v37  ;;  %1377 = vmatpush3.msra.mxu1 %v843_v38 }
 0x14c   : > { %873 = vmatprep.subr.mxu0 %v839_v39  ;;  %1378 = vmatprep.subr.mxu1 %v1641_v0 }
 0x14d   : > { %874 = vmatpush1.msra.mxu0 %v838_v40  ;;  %1379 = vmatpush3.msra.mxu1 %v840_v41 }
 0x14e   : > { %875 = vmatprep.subr.mxu0 %v836_v42  ;;  %1380 = vmatprep.subr.mxu1 %v1641_v0 }
 0x14f   : > { %876 = vmatpush1.msra.mxu0 %v835_v43  ;;  %1381 = vmatpush3.msra.mxu1 %v837_v44 }
 0x150   : > { %877 = vmatprep.subr.mxu0 %v833_v45  ;;  %1382 = vmatprep.subr.mxu1 %v1641_v0 }
 0x151   : > { %878 = vmatpush1.msra.mxu0 %v832_v46  ;;  %1383 = vmatpush3.msra.mxu1 %v834_v47 }
 0x152   : > { %879 = vmatprep.subr.mxu0 %v830_v48  ;;  %1384 = vmatprep.subr.mxu1 %v1641_v0 }
 0x153   : > { %880 = vmatpush1.msra.mxu0 %v829_v49  ;;  %1385 = vmatpush3.msra.mxu1 %v831_v50 }
 0x154   : > { %881 = vmatprep.subr.mxu0 %v827_v51  ;;  %1386 = vmatprep.subr.mxu1 %v1641_v0 }
 0x155   : > { %882 = vmatpush1.msra.mxu0 %v826_v52  ;;  %1387 = vmatpush3.msra.mxu1 %v828_v53 }
 0x156   : > { %883 = vmatprep.subr.mxu0 %v824_v54  ;;  %1388 = vmatprep.subr.mxu1 %v1641_v0 }
 0x157   : > { %884 = vmatpush1.msra.mxu0 %v823_v55  ;;  %1389 = vmatpush3.msra.mxu1 %v825_v56 }
 0x158   : > { %885 = vmatprep.subr.mxu0 %v821_v57  ;;  %1390 = vmatprep.subr.mxu1 %v1641_v0 }
 0x159   : > { %886 = vmatpush1.msra.mxu0 %v820_v58  ;;  %1391 = vmatpush3.msra.mxu1 %v822_v59 }
 0x15a   : > { %887 = vmatprep.subr.mxu0 %v818_v60  ;;  %1392 = vmatprep.subr.mxu1 %v1641_v0 }
 0x15b   : > { %888 = vmatpush1.msra.mxu0 %v817_v61  ;;  %1393 = vmatpush3.msra.mxu1 %v819_v62 }
 0x15c   : > { %889 = vmatprep.subr.mxu0 %v815_v63  ;;  %1394 = vmatprep.subr.mxu1 %v1641_v0 }
 0x15d   : > { %890 = vmatpush1.msra.mxu0 %v814_v1  ;;  %1395 = vmatpush3.msra.mxu1 %v816_v2 }
 0x15e   : > { %891 = vmatprep.subr.mxu0 %v812_v3  ;;  %1396 = vmatprep.subr.mxu1 %v1641_v0 }
 0x15f   : > { %892 = vmatpush1.msra.mxu0 %v811_v4  ;;  %1397 = vmatpush3.msra.mxu1 %v813_v5 }
 0x160   : > { %893 = vmatprep.subr.mxu0 %v809_v6  ;;  %1398 = vmatprep.subr.mxu1 %v1641_v0 }
 0x161   : > { %931 = vmatprep.mubr.f32.mxu0 %v1641_v0  ;;  %1404 = vmatprep.mubr.msk.f32.mxu1 %vm1642_vm0, %v1641_v0 }
 0x162   : > { %894 = vmatpush1.msra.mxu0 %v808_v7  ;;  %1399 = vmatpush3.msra.mxu1 %v810_v8 }
 0x163   : > { %895 = vmatprep.subr.mxu0 %v806_v9  ;;  %1400 = vmatprep.subr.mxu1 %v1641_v0 }
 0x164   : > { %896 = vmatpush1.msra.mxu0 %v805_v10  ;;  %1401 = vmatpush3.msra.mxu1 %v807_v11 }
 0x165   : > { %897 = vmatprep.subr.mxu0 %v803_v12  ;;  %1402 = vmatprep.subr.mxu1 %v1641_v0 }
 0x166   : > { %898 = vmatpush1.msra.mxu0 %v802_v13  ;;  %1403 = vmatpush3.msra.mxu1 %v804_v14 }
 0x206   : > { %v704_v0 = vpop.f32.mrf.mxu0  ;;  %v797_v17 = vpop.f32.mrf.mxu1 }
 0x207   : > { %v705_v18 = vadd.f32 %v1159_v15, %v704_v0  ;;  %v798_v19 = vadd.f32 %v1160_v16, %v797_v17 }
 0x208   : > { %v1336_v20 = vpop.f32.mrf.mxu0  ;;  %v1371_v21 = vpop.f32.mrf.mxu1 }
 0x209   : > { %1009 = vst.msk [vmem:[%s415_s25] sm:$0xff] %vm1008_vm1, %v705_v18  ;;  %v801_v22 = vmax.f32 %v798_v19, 0.0 }
 0x20b   : > { %932 = vmatmul.mubr.f32.vlgmr.msra.gmra.mxu0 %v801_v22  ;;  %1405 = vmatmul.mubr.f32.vlgmr.msra.gmra.mxu1 %v801_v22 }
 0x2cb   : > { %v933_v32 = vpop.f32.mrf.mxu0  ;;  %v1004_v33 = vpop.f32.mrf.mxu1 }
 0x2cc   : > { %v934_v34 = vadd.f32 %v933_v32, %v855_v29  ;;  %v1005_v35 = vadd.f32 %v1004_v33, %v863_v30 }
 0x2cd   : > { %v935_v36 = vpop.f32.mrf.mxu0  ;;  %v1406_v37 = vpop.f32.mrf.mxu1 }
 0x2ce   : > { %1010 = vst [vmem:[%s405_s26] sm:$0xff] %v934_v34  ;;  %1012 = vst [vmem:[%s405_s26 + $0x10] sm:$0xff] %v1005_v35  ;;  %v936_v38 = vadd.f32 %v935_v36, %v859_v31 }
 0x2d0   : > { %1011 = vst [vmem:[%s405_s26 + $0x8] sm:$0xff] %v936_v38 }
 0x2d1   : > { %1577 = shalt.err (!%p1574_p12)
}
 0x2d2   : > { %s1578_s21 = scalar_lea.hbm %s1030_s30, 384  ;;  %s1582_s25 = scalar_lea.hbm %s2066_s9, 2688 }
 0x2d3   : > { %p1579_p3 = scmp.ne.s32.totalorder %s1030_s30, %s1578_s21  ;;  %p1583_p8 = scmp.lt.s32.totalorder %s1030_s30, %s2066_s9 }
 0x2d4   : > { %p1584_p7 = scmp.lt.s32.totalorder %s1582_s25, %s1578_s21 }
 0x2d5   : > { %p1580_p0 = pnand %p1579_p3, %p2093_p1 }
 0x2d6   : > { %p1585_p10 = por %p1584_p7, %p1583_p8 }
 0x2d7   : > { %p1581_p4 = pneg %p1580_p0 }
 0x2d9   : > { %p1586_p13 = pnand %p1585_p10, %p1581_p4 }
 0x2db   : > { %1589 = shalt.err (!%p1586_p13)
}
 0x2dc   : > { %1421 = dma.vmem_to_hbm [thread:$0]  (%p2093_p1), %s1033_s12, 384, %s1030_s30, %s1014_s17  }
 0x2dd PF: > { %p1443_p2 = scmp.ge.s32.totalorder %s1632_s16, 2  ;;  %s1047_s23 = sand.u32 1, %s1620_s13  }
 0x2de   : > { %p2094_p6 = scmp.ne.s32.totalorder %s2079_s20, 0  ;;  %s1048_s26 = scalar_lea.sflag [#allocation4], %s1047_s23 }
 0x2e0   : > { %p1435_p11 = pnand %p1443_p2, %p2094_p6 }
 0x2e2   : > { %p1436_p5 = pneg %p1435_p11 }
 0x2e4   : > { %1615 = dma.done.wait (%p1436_p5), %s1048_s26, 384  }
 0x2e5   : > { %1617 = vsyncadd (%p1436_p5), %s1048_s26, 4294966912  ;;  %s2095_s16 = sld [smem:[#allocation13_spill]]  ;;  %s2098_s13 = smov %s1624_s14 }
 0x2e6   : > { %s2096_s24 = sld [smem:[#allocation12_spill]] }
 0x2e7   : > { %s2097_s15 = sld [smem:[#allocation14_spill]] }
 0x2eb   : > { %p25_p9 = scmp.ge.s32.totalorder %s2095_s16, 9  }
 0x2ec   : > { %s2099_s14 = smov %s2096_s24 }
 0x2ed   :  { %27 = sbr.rel (!%p25_p9) target bundleno = 9 (0x9), region = 121 }
 0x2f2   :  { %1060 = vsyncpa [#allocation3], 1 }
 0x2f3   :  { %1062 = vsyncpa [#allocation3 + $0x1], 1 }
 0x2f4   :  { %1063 = vsyncpa [#allocation6], 1 }
 0x2f5   :  { %1064 = vsyncpa [#allocation4], 1 }
 0x2f6   :  { %1066 = vsyncpa [#allocation4 + $0x1], 1 }

</bundles_post_ra>
